<compile_context>
chip_gen: v7x
topology: tpu7x:2x2x1
jax: 0.10.0
libtpu: 0.0.40
codegen_flags: <defaults>
</compile_context>

<pallas_src>
import functools

import jax
import jax.numpy as jnp
from jax import lax
from jax.experimental import pallas as pl
from jax.experimental.pallas import tpu as pltpu


# ----------------------------------------------------------------------------
# Fused MHA kernel: one grid step = one batch element.
# Block shapes: q (1,Sq,H), k/v (1,Sk,H), weights (H,H) pre-transposed (in,out),
# biases (1,H); outputs x (1,Sq,H), attn (1,nH,Sq,Sk).
# ----------------------------------------------------------------------------
def _mha_kernel(q_ref, k_ref, v_ref,
                wq_ref, wk_ref, wv_ref, wo_ref,
                bq_ref, bk_ref, bv_ref, bo_ref,
                x_ref, attn_ref,
                *, n_heads, head_dim, scale_inv, matmul_dtype):
    mm = matmul_dtype

    def proj(x, w_ref, b_ref):
        # x: (S, H) activation; w_ref: (H, H) already transposed + cast to mm.
        y = jnp.dot(x.astype(mm), w_ref[...], preferred_element_type=jnp.float32)
        return y + b_ref[...]                                   # (S, H) f32

    q = proj(q_ref[0], wq_ref, bq_ref) * scale_inv              # fold 1/sqrt(D) into Q
    k = proj(k_ref[0], wk_ref, bk_ref)
    v = proj(v_ref[0], wv_ref, bv_ref)

    ctx_parts = []
    for h in range(n_heads):                                    # static unrolled loop
        lo = h * head_dim
        hi = lo + head_dim
        qh = q[:, lo:hi].astype(mm)                             # (Sq, D)
        kh = k[:, lo:hi].astype(mm)                             # (Sk, D)
        vh = v[:, lo:hi].astype(mm)                             # (Sk, D)

        # energy = qh @ kh^T without an explicit transpose of K.
        energy = lax.dot_general(
            qh, kh, dimension_numbers=(((1,), (1,)), ((), ())),
            preferred_element_type=jnp.float32)                 # (Sq, Sk) f32

        m = jnp.max(energy, axis=-1, keepdims=True)
        p = jnp.exp(energy - m)
        denom = jnp.sum(p, axis=-1, keepdims=True)              # >= 1 always
        attn = p * pl.reciprocal(denom, approx=True)            # EUP vrcp

        attn_ref[0, h] = attn.astype(attn_ref.dtype)
        ctx_parts.append(
            jnp.dot(attn.astype(mm), vh, preferred_element_type=jnp.float32))

    ctx = jnp.concatenate(ctx_parts, axis=-1)                   # (Sq, H) lane-dense

    x = jnp.dot(ctx.astype(mm), wo_ref[...],
                preferred_element_type=jnp.float32) + bo_ref[...]
    x_ref[0] = x.astype(x_ref.dtype)


# ----------------------------------------------------------------------------
# Module-level forward (single pallas_call).
# ----------------------------------------------------------------------------
def multi_head_attention_forward(params, query, key, value, n_heads,
                                 mask=None, matmul_dtype=jnp.bfloat16):
    """query: (B,Sq,H), key/value: (B,Sk,H). Returns (x (B,Sq,H), attn (B,nH,Sq,Sk))."""
    if mask is not None:
        # TODO(synk): masked_fill(mask == 0, -1e10) before softmax not implemented.
        raise NotImplementedError("attention mask not implemented")

    B, Sq, H = query.shape
    Sk = key.shape[1]
    assert H % n_heads == 0
    head_dim = H // n_heads
    scale_inv = 1.0 / (float(head_dim) ** 0.5)
    mm = jnp.dtype(matmul_dtype)

    # nn.Linear stores W as (H_out, H_in); pre-transpose once so the kernel
    # computes x @ W directly (no in-kernel transpose), cast to MXU dtype.
    def prep_w(w):
        return jnp.asarray(w).T.astype(mm)                      # (H_in, H_out)

    def prep_b(b):
        return jnp.asarray(b, jnp.float32).reshape(1, -1)       # (1, H_out)

    wq, wk, wv, wo = (prep_w(params[k_]) for k_ in ("wq", "wk", "wv", "wo"))
    bq, bk, bv, bo = (prep_b(params[k_]) for k_ in ("bq", "bk", "bv", "bo"))

    kernel = functools.partial(
        _mha_kernel, n_heads=n_heads, head_dim=head_dim,
        scale_inv=scale_inv, matmul_dtype=mm)

    weight_spec = pl.BlockSpec((H, H), lambda b: (0, 0))
    bias_spec = pl.BlockSpec((1, H), lambda b: (0, 0))

    x, attn = pl.pallas_call(
        kernel,
        out_shape=(
            jax.ShapeDtypeStruct((B, Sq, H), query.dtype),
            jax.ShapeDtypeStruct((B, n_heads, Sq, Sk), query.dtype),
        ),
        grid=(B,),
        in_specs=[
            pl.BlockSpec((1, Sq, H), lambda b: (b, 0, 0)),       # query
            pl.BlockSpec((1, Sk, H), lambda b: (b, 0, 0)),       # key
            pl.BlockSpec((1, Sk, H), lambda b: (b, 0, 0)),       # value
            weight_spec, weight_spec, weight_spec, weight_spec,  # wq wk wv wo
            bias_spec, bias_spec, bias_spec, bias_spec,          # bq bk bv bo
        ],
        out_specs=(
            pl.BlockSpec((1, Sq, H), lambda b: (b, 0, 0)),
            pl.BlockSpec((1, n_heads, Sq, Sk), lambda b: (b, 0, 0, 0)),
        ),
        compiler_params=pltpu.CompilerParams(
            dimension_semantics=("parallel",)),
    )(query, key, value, wq, wk, wv, wo, bq, bk, bv, bo)
    return x, attn


# ----------------------------------------------------------------------------
# Pure-JAX reference (mirrors the PyTorch module) + param init
# ----------------------------------------------------------------------------
def mha_reference(params, query, key, value, n_heads):
    B, Sq, H = query.shape
    Sk = key.shape[1]
    D = H // n_heads

    def lin(x, w, b):
        return x @ w.T + b

    Q = lin(query, params["wq"], params["bq"])
    K = lin(key, params["wk"], params["bk"])
    V = lin(value, params["wv"], params["bv"])
    Qh = Q.reshape(B, Sq, n_heads, D).transpose(0, 2, 1, 3)
    Kh = K.reshape(B, Sk, n_heads, D).transpose(0, 2, 1, 3)
    Vh = V.reshape(B, Sk, n_heads, D).transpose(0, 2, 1, 3)
    energy = jnp.einsum("bhqd,bhkd->bhqk", Qh, Kh) / (float(D) ** 0.5)
    attn = jax.nn.softmax(energy, axis=-1)
    ctx = jnp.einsum("bhqk,bhkd->bhqd", attn, Vh)
    x = ctx.transpose(0, 2, 1, 3).reshape(B, Sq, H)
    x = lin(x, params["wo"], params["bo"])
    return x, attn


def init_params(key, hid_dim):
    ks = jax.random.split(key, 8)
    s = 1.0 / (hid_dim ** 0.5)
    mk = lambda k, shape: jax.random.uniform(k, shape, jnp.float32, -s, s)
    return {
        "wq": mk(ks[0], (hid_dim, hid_dim)), "bq": mk(ks[1], (hid_dim,)),
        "wk": mk(ks[2], (hid_dim, hid_dim)), "bk": mk(ks[3], (hid_dim,)),
        "wv": mk(ks[4], (hid_dim, hid_dim)), "bv": mk(ks[5], (hid_dim,)),
        "wo": mk(ks[6], (hid_dim, hid_dim)), "bo": mk(ks[7], (hid_dim,)),
    }


if __name__ == "__main__":
    hid_dim = 32
    n_heads = 4
    batch = 2
    seq = 8

    root = jax.random.PRNGKey(0)
    k_par, k_q, k_k, k_v = jax.random.split(root, 4)

    params = init_params(k_par, hid_dim)
    query = jax.random.normal(k_q, (batch, seq, hid_dim), jnp.float32)
    key_in = jax.random.normal(k_k, (batch, seq, hid_dim), jnp.float32)
    value = jax.random.normal(k_v, (batch, seq, hid_dim), jnp.float32)

    # Pure-JAX reference.
    x_ref, attn_ref = mha_reference(params, query, key_in, value, n_heads)

    # bf16-MXU path (default; what v6e/v7x want).
    x_bf, attn_bf = multi_head_attention_forward(params, query, key_in, value, n_heads)
    jax.block_until_ready((x_bf, attn_bf))

    # f32-MXU path (strict numerical check of the same kernel).
    x_f32, attn_f32 = multi_head_attention_forward(
        params, query, key_in, value, n_heads, matmul_dtype=jnp.float32)
    jax.block_until_ready((x_f32, attn_f32))

    # Shapes + softmax rows sum to 1.
    assert x_bf.shape == (batch, seq, hid_dim)
    assert attn_bf.shape == (batch, n_heads, seq, seq)
    assert jnp.allclose(jnp.sum(attn_bf, axis=-1), 1.0, atol=5e-3)

    # Strict check for the f32 path; looser band for the bf16-operand path.
    assert jnp.allclose(x_f32, x_ref, rtol=5e-3, atol=5e-3)
    assert jnp.allclose(attn_f32, attn_ref, rtol=5e-3, atol=5e-3)
    assert jnp.allclose(x_bf, x_ref, rtol=5e-2, atol=5e-2)
    assert jnp.allclose(attn_bf, attn_ref, rtol=5e-2, atol=5e-2)

    print("KERNEL_OK")
</pallas_src>

<mosaic_0001>
module attributes {stable_mosaic.version = 11 : i64} {
  func.func @_mha_kernel(%arg0: i32, %arg1: memref<1x8x32xf32, #tpu.memory_space<vmem>>, %arg2: memref<1x8x32xf32, #tpu.memory_space<vmem>>, %arg3: memref<1x8x32xf32, #tpu.memory_space<vmem>>, %arg4: memref<32x32xbf16, #tpu.memory_space<vmem>>, %arg5: memref<32x32xbf16, #tpu.memory_space<vmem>>, %arg6: memref<32x32xbf16, #tpu.memory_space<vmem>>, %arg7: memref<32x32xbf16, #tpu.memory_space<vmem>>, %arg8: memref<1x32xf32, #tpu.memory_space<vmem>>, %arg9: memref<1x32xf32, #tpu.memory_space<vmem>>, %arg10: memref<1x32xf32, #tpu.memory_space<vmem>>, %arg11: memref<1x32xf32, #tpu.memory_space<vmem>>, %arg12: memref<1x8x32xf32, #tpu.memory_space<vmem>>, %arg13: memref<1x4x8x8xf32, #tpu.memory_space<vmem>>) attributes {dimension_semantics = [#tpu.dimension_semantics<parallel>], iteration_bounds = array<i64: 2>, scalar_prefetch = 0 : i64, scratch_operands = 0 : i64, tpu.core_type = #tpu.core_type<tc>, window_params = [{transform_indices = @transform_0, window_bounds = array<i64: 1, 8, 32>}, {transform_indices = @transform_1, window_bounds = array<i64: 1, 8, 32>}, {transform_indices = @transform_2, window_bounds = array<i64: 1, 8, 32>}, {pipeline_mode = #tpu.pipeline_mode<synchronous>, transform_indices = @transform_3, window_bounds = array<i64: 32, 32>}, {pipeline_mode = #tpu.pipeline_mode<synchronous>, transform_indices = @transform_4, window_bounds = array<i64: 32, 32>}, {pipeline_mode = #tpu.pipeline_mode<synchronous>, transform_indices = @transform_5, window_bounds = array<i64: 32, 32>}, {pipeline_mode = #tpu.pipeline_mode<synchronous>, transform_indices = @transform_6, window_bounds = array<i64: 32, 32>}, {pipeline_mode = #tpu.pipeline_mode<synchronous>, transform_indices = @transform_7, window_bounds = array<i64: 1, 32>}, {pipeline_mode = #tpu.pipeline_mode<synchronous>, transform_indices = @transform_8, window_bounds = array<i64: 1, 32>}, {pipeline_mode = #tpu.pipeline_mode<synchronous>, transform_indices = @transform_9, window_bounds = array<i64: 1, 32>}, {pipeline_mode = #tpu.pipeline_mode<synchronous>, transform_indices = @transform_10, window_bounds = array<i64: 1, 32>}, {transform_indices = @transform_11, window_bounds = array<i64: 1, 8, 32>}, {transform_indices = @transform_12, window_bounds = array<i64: 1, 4, 8, 8>}]} {
    %c0 = arith.constant 0 : index
    %c0_0 = arith.constant 0 : index
    %c0_1 = arith.constant 0 : index
    %0 = vector.load %arg1[%c0, %c0_0, %c0_1] : memref<1x8x32xf32, #tpu.memory_space<vmem>>, vector<1x8x32xf32>
    %1 = vector.shape_cast %0 : vector<1x8x32xf32> to vector<8x32xf32>
    %2 = arith.truncf %1 : vector<8x32xf32> to vector<8x32xbf16>
    %c0_2 = arith.constant 0 : index
    %c0_3 = arith.constant 0 : index
    %3 = vector.load %arg4[%c0_2, %c0_3] : memref<32x32xbf16, #tpu.memory_space<vmem>>, vector<32x32xbf16>
    %cst = arith.constant dense<0.000000e+00> : vector<8x32xf32>
    %4 = tpu.matmul %2, %3, %cst {dimension_numbers = #tpu.dot_dimension_numbers<[1], [0], [0], [1], [0, 0, 1, 1], [], []>} : vector<8x32xbf16>, vector<32x32xbf16>, vector<8x32xf32> -> vector<8x32xf32>
    %c0_4 = arith.constant 0 : index
    %c0_5 = arith.constant 0 : index
    %5 = vector.load %arg8[%c0_4, %c0_5] : memref<1x32xf32, #tpu.memory_space<vmem>>, vector<1x32xf32>
    %6 = vector.broadcast %5 : vector<1x32xf32> to vector<8x32xf32>
    %7 = arith.addf %4, %6 : vector<8x32xf32>
    %cst_6 = arith.constant 0.353553385 : f32
    %8 = vector.broadcast %cst_6 : f32 to vector<8x32xf32>
    %9 = arith.mulf %7, %8 : vector<8x32xf32>
    %c0_7 = arith.constant 0 : index
    %c0_8 = arith.constant 0 : index
    %c0_9 = arith.constant 0 : index
    %10 = vector.load %arg2[%c0_7, %c0_8, %c0_9] : memref<1x8x32xf32, #tpu.memory_space<vmem>>, vector<1x8x32xf32>
    %11 = vector.shape_cast %10 : vector<1x8x32xf32> to vector<8x32xf32>
    %12 = arith.truncf %11 : vector<8x32xf32> to vector<8x32xbf16>
    %c0_10 = arith.constant 0 : index
    %c0_11 = arith.constant 0 : index
    %13 = vector.load %arg5[%c0_10, %c0_11] : memref<32x32xbf16, #tpu.memory_space<vmem>>, vector<32x32xbf16>
    %cst_12 = arith.constant dense<0.000000e+00> : vector<8x32xf32>
    %14 = tpu.matmul %12, %13, %cst_12 {dimension_numbers = #tpu.dot_dimension_numbers<[1], [0], [0], [1], [0, 0, 1, 1], [], []>} : vector<8x32xbf16>, vector<32x32xbf16>, vector<8x32xf32> -> vector<8x32xf32>
    %c0_13 = arith.constant 0 : index
    %c0_14 = arith.constant 0 : index
    %15 = vector.load %arg9[%c0_13, %c0_14] : memref<1x32xf32, #tpu.memory_space<vmem>>, vector<1x32xf32>
    %16 = vector.broadcast %15 : vector<1x32xf32> to vector<8x32xf32>
    %17 = arith.addf %14, %16 : vector<8x32xf32>
    %c0_15 = arith.constant 0 : index
    %c0_16 = arith.constant 0 : index
    %c0_17 = arith.constant 0 : index
    %18 = vector.load %arg3[%c0_15, %c0_16, %c0_17] : memref<1x8x32xf32, #tpu.memory_space<vmem>>, vector<1x8x32xf32>
    %19 = vector.shape_cast %18 : vector<1x8x32xf32> to vector<8x32xf32>
    %20 = arith.truncf %19 : vector<8x32xf32> to vector<8x32xbf16>
    %c0_18 = arith.constant 0 : index
    %c0_19 = arith.constant 0 : index
    %21 = vector.load %arg6[%c0_18, %c0_19] : memref<32x32xbf16, #tpu.memory_space<vmem>>, vector<32x32xbf16>
    %cst_20 = arith.constant dense<0.000000e+00> : vector<8x32xf32>
    %22 = tpu.matmul %20, %21, %cst_20 {dimension_numbers = #tpu.dot_dimension_numbers<[1], [0], [0], [1], [0, 0, 1, 1], [], []>} : vector<8x32xbf16>, vector<32x32xbf16>, vector<8x32xf32> -> vector<8x32xf32>
    %c0_21 = arith.constant 0 : index
    %c0_22 = arith.constant 0 : index
    %23 = vector.load %arg10[%c0_21, %c0_22] : memref<1x32xf32, #tpu.memory_space<vmem>>, vector<1x32xf32>
    %24 = vector.broadcast %23 : vector<1x32xf32> to vector<8x32xf32>
    %25 = arith.addf %22, %24 : vector<8x32xf32>
    %26 = vector.extract_strided_slice %9 {offsets = [0, 0], sizes = [8, 8], strides = [1, 1]} : vector<8x32xf32> to vector<8x8xf32>
    %27 = arith.truncf %26 : vector<8x8xf32> to vector<8x8xbf16>
    %28 = vector.extract_strided_slice %17 {offsets = [0, 0], sizes = [8, 8], strides = [1, 1]} : vector<8x32xf32> to vector<8x8xf32>
    %29 = arith.truncf %28 : vector<8x8xf32> to vector<8x8xbf16>
    %30 = vector.extract_strided_slice %25 {offsets = [0, 0], sizes = [8, 8], strides = [1, 1]} : vector<8x32xf32> to vector<8x8xf32>
    %31 = arith.truncf %30 : vector<8x8xf32> to vector<8x8xbf16>
    %cst_23 = arith.constant dense<0.000000e+00> : vector<8x8xf32>
    %32 = tpu.matmul %27, %29, %cst_23 {dimension_numbers = #tpu.dot_dimension_numbers<[1], [1], [0], [0], [0, 0, 1, 0], [], []>} : vector<8x8xbf16>, vector<8x8xbf16>, vector<8x8xf32> -> vector<8x8xf32>
    %cst_24 = arith.constant dense<0xFF800000> : vector<8xf32>
    %33 = vector.multi_reduction <maximumf>, %32, %cst_24 [1] : vector<8x8xf32> to vector<8xf32>
    %34 = vector.shape_cast %33 : vector<8xf32> to vector<8x1xf32>
    %35 = vector.broadcast %34 : vector<8x1xf32> to vector<8x8xf32>
    %36 = arith.subf %32, %35 : vector<8x8xf32>
    %37 = math.exp %36 : vector<8x8xf32>
    %cst_25 = arith.constant dense<0.000000e+00> : vector<8xf32>
    %38 = vector.multi_reduction <add>, %37, %cst_25 [1] : vector<8x8xf32> to vector<8xf32>
    %39 = vector.shape_cast %38 : vector<8xf32> to vector<8x1xf32>
    %40 = tpu.reciprocal %39 {approx = true} : vector<8x1xf32> -> vector<8x1xf32>
    %41 = vector.broadcast %40 : vector<8x1xf32> to vector<8x8xf32>
    %42 = arith.mulf %37, %41 : vector<8x8xf32>
    %c0_26 = arith.constant 0 : index
    %c0_27 = arith.constant 0 : index
    %c0_28 = arith.constant 0 : index
    %c0_29 = arith.constant 0 : index
    %43 = vector.load %arg13[%c0_26, %c0_27, %c0_28, %c0_29] : memref<1x4x8x8xf32, #tpu.memory_space<vmem>>, vector<1x1x8x8xf32>
    %44 = vector.shape_cast %43 : vector<1x1x8x8xf32> to vector<8x8xf32>
    %45 = vector.shape_cast %42 : vector<8x8xf32> to vector<1x1x8x8xf32>
    tpu.vector_store %arg13[%c0_26, %c0_27, %c0_28, %c0_29], %45 {strides = array<i32>} : memref<1x4x8x8xf32, #tpu.memory_space<vmem>>, vector<1x1x8x8xf32>,
    %46 = arith.truncf %42 : vector<8x8xf32> to vector<8x8xbf16>
    %cst_30 = arith.constant dense<0.000000e+00> : vector<8x8xf32>
    %47 = tpu.matmul %46, %31, %cst_30 {dimension_numbers = #tpu.dot_dimension_numbers<[1], [0], [0], [1], [0, 0, 1, 1], [], []>} : vector<8x8xbf16>, vector<8x8xbf16>, vector<8x8xf32> -> vector<8x8xf32>
    %48 = vector.extract_strided_slice %9 {offsets = [0, 8], sizes = [8, 8], strides = [1, 1]} : vector<8x32xf32> to vector<8x8xf32>
    %49 = arith.truncf %48 : vector<8x8xf32> to vector<8x8xbf16>
    %50 = vector.extract_strided_slice %17 {offsets = [0, 8], sizes = [8, 8], strides = [1, 1]} : vector<8x32xf32> to vector<8x8xf32>
    %51 = arith.truncf %50 : vector<8x8xf32> to vector<8x8xbf16>
    %52 = vector.extract_strided_slice %25 {offsets = [0, 8], sizes = [8, 8], strides = [1, 1]} : vector<8x32xf32> to vector<8x8xf32>
    %53 = arith.truncf %52 : vector<8x8xf32> to vector<8x8xbf16>
    %cst_31 = arith.constant dense<0.000000e+00> : vector<8x8xf32>
    %54 = tpu.matmul %49, %51, %cst_31 {dimension_numbers = #tpu.dot_dimension_numbers<[1], [1], [0], [0], [0, 0, 1, 0], [], []>} : vector<8x8xbf16>, vector<8x8xbf16>, vector<8x8xf32> -> vector<8x8xf32>
    %cst_32 = arith.constant dense<0xFF800000> : vector<8xf32>
    %55 = vector.multi_reduction <maximumf>, %54, %cst_32 [1] : vector<8x8xf32> to vector<8xf32>
    %56 = vector.shape_cast %55 : vector<8xf32> to vector<8x1xf32>
    %57 = vector.broadcast %56 : vector<8x1xf32> to vector<8x8xf32>
    %58 = arith.subf %54, %57 : vector<8x8xf32>
    %59 = math.exp %58 : vector<8x8xf32>
    %cst_33 = arith.constant dense<0.000000e+00> : vector<8xf32>
    %60 = vector.multi_reduction <add>, %59, %cst_33 [1] : vector<8x8xf32> to vector<8xf32>
    %61 = vector.shape_cast %60 : vector<8xf32> to vector<8x1xf32>
    %62 = tpu.reciprocal %61 {approx = true} : vector<8x1xf32> -> vector<8x1xf32>
    %63 = vector.broadcast %62 : vector<8x1xf32> to vector<8x8xf32>
    %64 = arith.mulf %59, %63 : vector<8x8xf32>
    %c0_34 = arith.constant 0 : index
    %c1 = arith.constant 1 : index
    %c0_35 = arith.constant 0 : index
    %c0_36 = arith.constant 0 : index
    %65 = vector.load %arg13[%c0_34, %c1, %c0_35, %c0_36] : memref<1x4x8x8xf32, #tpu.memory_space<vmem>>, vector<1x1x8x8xf32>
    %66 = vector.shape_cast %65 : vector<1x1x8x8xf32> to vector<8x8xf32>
    %67 = vector.shape_cast %64 : vector<8x8xf32> to vector<1x1x8x8xf32>
    tpu.vector_store %arg13[%c0_34, %c1, %c0_35, %c0_36], %67 {strides = array<i32>} : memref<1x4x8x8xf32, #tpu.memory_space<vmem>>, vector<1x1x8x8xf32>,
    %68 = arith.truncf %64 : vector<8x8xf32> to vector<8x8xbf16>
    %cst_37 = arith.constant dense<0.000000e+00> : vector<8x8xf32>
    %69 = tpu.matmul %68, %53, %cst_37 {dimension_numbers = #tpu.dot_dimension_numbers<[1], [0], [0], [1], [0, 0, 1, 1], [], []>} : vector<8x8xbf16>, vector<8x8xbf16>, vector<8x8xf32> -> vector<8x8xf32>
    %70 = vector.extract_strided_slice %9 {offsets = [0, 16], sizes = [8, 8], strides = [1, 1]} : vector<8x32xf32> to vector<8x8xf32>
    %71 = arith.truncf %70 : vector<8x8xf32> to vector<8x8xbf16>
    %72 = vector.extract_strided_slice %17 {offsets = [0, 16], sizes = [8, 8], strides = [1, 1]} : vector<8x32xf32> to vector<8x8xf32>
    %73 = arith.truncf %72 : vector<8x8xf32> to vector<8x8xbf16>
    %74 = vector.extract_strided_slice %25 {offsets = [0, 16], sizes = [8, 8], strides = [1, 1]} : vector<8x32xf32> to vector<8x8xf32>
    %75 = arith.truncf %74 : vector<8x8xf32> to vector<8x8xbf16>
    %cst_38 = arith.constant dense<0.000000e+00> : vector<8x8xf32>
    %76 = tpu.matmul %71, %73, %cst_38 {dimension_numbers = #tpu.dot_dimension_numbers<[1], [1], [0], [0], [0, 0, 1, 0], [], []>} : vector<8x8xbf16>, vector<8x8xbf16>, vector<8x8xf32> -> vector<8x8xf32>
    %cst_39 = arith.constant dense<0xFF800000> : vector<8xf32>
    %77 = vector.multi_reduction <maximumf>, %76, %cst_39 [1] : vector<8x8xf32> to vector<8xf32>
    %78 = vector.shape_cast %77 : vector<8xf32> to vector<8x1xf32>
    %79 = vector.broadcast %78 : vector<8x1xf32> to vector<8x8xf32>
    %80 = arith.subf %76, %79 : vector<8x8xf32>
    %81 = math.exp %80 : vector<8x8xf32>
    %cst_40 = arith.constant dense<0.000000e+00> : vector<8xf32>
    %82 = vector.multi_reduction <add>, %81, %cst_40 [1] : vector<8x8xf32> to vector<8xf32>
    %83 = vector.shape_cast %82 : vector<8xf32> to vector<8x1xf32>
    %84 = tpu.reciprocal %83 {approx = true} : vector<8x1xf32> -> vector<8x1xf32>
    %85 = vector.broadcast %84 : vector<8x1xf32> to vector<8x8xf32>
    %86 = arith.mulf %81, %85 : vector<8x8xf32>
    %c0_41 = arith.constant 0 : index
    %c2 = arith.constant 2 : index
    %c0_42 = arith.constant 0 : index
    %c0_43 = arith.constant 0 : index
    %87 = vector.load %arg13[%c0_41, %c2, %c0_42, %c0_43] : memref<1x4x8x8xf32, #tpu.memory_space<vmem>>, vector<1x1x8x8xf32>
    %88 = vector.shape_cast %87 : vector<1x1x8x8xf32> to vector<8x8xf32>
    %89 = vector.shape_cast %86 : vector<8x8xf32> to vector<1x1x8x8xf32>
    tpu.vector_store %arg13[%c0_41, %c2, %c0_42, %c0_43], %89 {strides = array<i32>} : memref<1x4x8x8xf32, #tpu.memory_space<vmem>>, vector<1x1x8x8xf32>,
    %90 = arith.truncf %86 : vector<8x8xf32> to vector<8x8xbf16>
    %cst_44 = arith.constant dense<0.000000e+00> : vector<8x8xf32>
    %91 = tpu.matmul %90, %75, %cst_44 {dimension_numbers = #tpu.dot_dimension_numbers<[1], [0], [0], [1], [0, 0, 1, 1], [], []>} : vector<8x8xbf16>, vector<8x8xbf16>, vector<8x8xf32> -> vector<8x8xf32>
    %92 = vector.extract_strided_slice %9 {offsets = [0, 24], sizes = [8, 8], strides = [1, 1]} : vector<8x32xf32> to vector<8x8xf32>
    %93 = arith.truncf %92 : vector<8x8xf32> to vector<8x8xbf16>
    %94 = vector.extract_strided_slice %17 {offsets = [0, 24], sizes = [8, 8], strides = [1, 1]} : vector<8x32xf32> to vector<8x8xf32>
    %95 = arith.truncf %94 : vector<8x8xf32> to vector<8x8xbf16>
    %96 = vector.extract_strided_slice %25 {offsets = [0, 24], sizes = [8, 8], strides = [1, 1]} : vector<8x32xf32> to vector<8x8xf32>
    %97 = arith.truncf %96 : vector<8x8xf32> to vector<8x8xbf16>
    %cst_45 = arith.constant dense<0.000000e+00> : vector<8x8xf32>
    %98 = tpu.matmul %93, %95, %cst_45 {dimension_numbers = #tpu.dot_dimension_numbers<[1], [1], [0], [0], [0, 0, 1, 0], [], []>} : vector<8x8xbf16>, vector<8x8xbf16>, vector<8x8xf32> -> vector<8x8xf32>
    %cst_46 = arith.constant dense<0xFF800000> : vector<8xf32>
    %99 = vector.multi_reduction <maximumf>, %98, %cst_46 [1] : vector<8x8xf32> to vector<8xf32>
    %100 = vector.shape_cast %99 : vector<8xf32> to vector<8x1xf32>
    %101 = vector.broadcast %100 : vector<8x1xf32> to vector<8x8xf32>
    %102 = arith.subf %98, %101 : vector<8x8xf32>
    %103 = math.exp %102 : vector<8x8xf32>
    %cst_47 = arith.constant dense<0.000000e+00> : vector<8xf32>
    %104 = vector.multi_reduction <add>, %103, %cst_47 [1] : vector<8x8xf32> to vector<8xf32>
    %105 = vector.shape_cast %104 : vector<8xf32> to vector<8x1xf32>
    %106 = tpu.reciprocal %105 {approx = true} : vector<8x1xf32> -> vector<8x1xf32>
    %107 = vector.broadcast %106 : vector<8x1xf32> to vector<8x8xf32>
    %108 = arith.mulf %103, %107 : vector<8x8xf32>
    %c0_48 = arith.constant 0 : index
    %c3 = arith.constant 3 : index
    %c0_49 = arith.constant 0 : index
    %c0_50 = arith.constant 0 : index
    %109 = vector.load %arg13[%c0_48, %c3, %c0_49, %c0_50] : memref<1x4x8x8xf32, #tpu.memory_space<vmem>>, vector<1x1x8x8xf32>
    %110 = vector.shape_cast %109 : vector<1x1x8x8xf32> to vector<8x8xf32>
    %111 = vector.shape_cast %108 : vector<8x8xf32> to vector<1x1x8x8xf32>
    tpu.vector_store %arg13[%c0_48, %c3, %c0_49, %c0_50], %111 {strides = array<i32>} : memref<1x4x8x8xf32, #tpu.memory_space<vmem>>, vector<1x1x8x8xf32>,
    %112 = arith.truncf %108 : vector<8x8xf32> to vector<8x8xbf16>
    %cst_51 = arith.constant dense<0.000000e+00> : vector<8x8xf32>
    %113 = tpu.matmul %112, %97, %cst_51 {dimension_numbers = #tpu.dot_dimension_numbers<[1], [0], [0], [1], [0, 0, 1, 1], [], []>} : vector<8x8xbf16>, vector<8x8xbf16>, vector<8x8xf32> -> vector<8x8xf32>
    %114 = tpu.concatenate %47, %69, %91, %113 in 1 : vector<8x8xf32>, vector<8x8xf32>, vector<8x8xf32>, vector<8x8xf32> -> vector<8x32xf32>
    %115 = arith.truncf %114 : vector<8x32xf32> to vector<8x32xbf16>
    %c0_52 = arith.constant 0 : index
    %c0_53 = arith.constant 0 : index
    %116 = vector.load %arg7[%c0_52, %c0_53] : memref<32x32xbf16, #tpu.memory_space<vmem>>, vector<32x32xbf16>
    %cst_54 = arith.constant dense<0.000000e+00> : vector<8x32xf32>
    %117 = tpu.matmul %115, %116, %cst_54 {dimension_numbers = #tpu.dot_dimension_numbers<[1], [0], [0], [1], [0, 0, 1, 1], [], []>} : vector<8x32xbf16>, vector<32x32xbf16>, vector<8x32xf32> -> vector<8x32xf32>
    %c0_55 = arith.constant 0 : index
    %c0_56 = arith.constant 0 : index
    %118 = vector.load %arg11[%c0_55, %c0_56] : memref<1x32xf32, #tpu.memory_space<vmem>>, vector<1x32xf32>
    %119 = vector.broadcast %118 : vector<1x32xf32> to vector<8x32xf32>
    %120 = arith.addf %117, %119 : vector<8x32xf32>
    %c0_57 = arith.constant 0 : index
    %c0_58 = arith.constant 0 : index
    %c0_59 = arith.constant 0 : index
    %121 = vector.load %arg12[%c0_57, %c0_58, %c0_59] : memref<1x8x32xf32, #tpu.memory_space<vmem>>, vector<1x8x32xf32>
    %122 = vector.shape_cast %121 : vector<1x8x32xf32> to vector<8x32xf32>
    %123 = vector.shape_cast %120 : vector<8x32xf32> to vector<1x8x32xf32>
    tpu.vector_store %arg12[%c0_57, %c0_58, %c0_59], %123 {strides = array<i32>} : memref<1x8x32xf32, #tpu.memory_space<vmem>>, vector<1x8x32xf32>,
    return
  }
  func.func @transform_0(%arg0: i32) -> (i32, i32, i32) {
    %c0_i32 = arith.constant 0 : i32
    %c0_i32_0 = arith.constant 0 : i32
    %c0_i32_1 = arith.constant 0 : i32
    return %arg0, %c0_i32, %c0_i32_0 : i32, i32, i32
  }
  func.func @transform_1(%arg0: i32) -> (i32, i32, i32) {
    %c0_i32 = arith.constant 0 : i32
    %c0_i32_0 = arith.constant 0 : i32
    %c0_i32_1 = arith.constant 0 : i32
    return %arg0, %c0_i32, %c0_i32_0 : i32, i32, i32
  }
  func.func @transform_2(%arg0: i32) -> (i32, i32, i32) {
    %c0_i32 = arith.constant 0 : i32
    %c0_i32_0 = arith.constant 0 : i32
    %c0_i32_1 = arith.constant 0 : i32
    return %arg0, %c0_i32, %c0_i32_0 : i32, i32, i32
  }
  func.func @transform_3(%arg0: i32) -> (i32, i32) {
    %c0_i32 = arith.constant 0 : i32
    %c0_i32_0 = arith.constant 0 : i32
    %c0_i32_1 = arith.constant 0 : i32
    return %c0_i32, %c0_i32_0 : i32, i32
  }
  func.func @transform_4(%arg0: i32) -> (i32, i32) {
    %c0_i32 = arith.constant 0 : i32
    %c0_i32_0 = arith.constant 0 : i32
    %c0_i32_1 = arith.constant 0 : i32
    return %c0_i32, %c0_i32_0 : i32, i32
  }
  func.func @transform_5(%arg0: i32) -> (i32, i32) {
    %c0_i32 = arith.constant 0 : i32
    %c0_i32_0 = arith.constant 0 : i32
    %c0_i32_1 = arith.constant 0 : i32
    return %c0_i32, %c0_i32_0 : i32, i32
  }
  func.func @transform_6(%arg0: i32) -> (i32, i32) {
    %c0_i32 = arith.constant 0 : i32
    %c0_i32_0 = arith.constant 0 : i32
    %c0_i32_1 = arith.constant 0 : i32
    return %c0_i32, %c0_i32_0 : i32, i32
  }
  func.func @transform_7(%arg0: i32) -> (i32, i32) {
    %c0_i32 = arith.constant 0 : i32
    %c0_i32_0 = arith.constant 0 : i32
    %c0_i32_1 = arith.constant 0 : i32
    return %c0_i32, %c0_i32_0 : i32, i32
  }
  func.func @transform_8(%arg0: i32) -> (i32, i32) {
    %c0_i32 = arith.constant 0 : i32
    %c0_i32_0 = arith.constant 0 : i32
    %c0_i32_1 = arith.constant 0 : i32
    return %c0_i32, %c0_i32_0 : i32, i32
  }
  func.func @transform_9(%arg0: i32) -> (i32, i32) {
    %c0_i32 = arith.constant 0 : i32
    %c0_i32_0 = arith.constant 0 : i32
    %c0_i32_1 = arith.constant 0 : i32
    return %c0_i32, %c0_i32_0 : i32, i32
  }
  func.func @transform_10(%arg0: i32) -> (i32, i32) {
    %c0_i32 = arith.constant 0 : i32
    %c0_i32_0 = arith.constant 0 : i32
    %c0_i32_1 = arith.constant 0 : i32
    return %c0_i32, %c0_i32_0 : i32, i32
  }
  func.func @transform_11(%arg0: i32) -> (i32, i32, i32) {
    %c0_i32 = arith.constant 0 : i32
    %c0_i32_0 = arith.constant 0 : i32
    %c0_i32_1 = arith.constant 0 : i32
    return %arg0, %c0_i32, %c0_i32_0 : i32, i32, i32
  }
  func.func @transform_12(%arg0: i32) -> (i32, i32, i32, i32) {
    %c0_i32 = arith.constant 0 : i32
    %c0_i32_0 = arith.constant 0 : i32
    %c0_i32_1 = arith.constant 0 : i32
    %c0_i32_2 = arith.constant 0 : i32
    return %arg0, %c0_i32, %c0_i32_0, %c0_i32_1 : i32, i32, i32, i32
  }
}

</mosaic_0001>

<bundles_post_ra>
// kernel: tpu_custom_call.1
= control target key start
LH: loop header
LB: loop body
LE: loop exit
PB: predicated region body
PF: predicated region fallthrough
CT: control target
= control target key end

     0   :  { %s2646_s0 = inlined_call_operand.hbm [shape: f32[2,8,32], index: 0, kind: input, shape index: {}]   ;;  %s2647_s1 = inlined_call_operand.hbm [shape: f32[2,8,32], index: 1, kind: input, shape index: {}]   ;;  %s2648_s2 = inlined_call_operand.hbm [shape: f32[2,8,32], index: 2, kind: input, shape index: {}]   ;;  %s2649_s3 = inlined_call_operand.hbm [shape: bf16[32,32], index: 3, kind: input, shape index: {}]   ;;  %s2650_s4 = inlined_call_operand.hbm [shape: bf16[32,32], index: 4, kind: input, shape index: {}]   ;;  %s2651_s5 = inlined_call_operand.vmem [shape: bf16[32,32], index: 5, kind: input, shape index: {}]   ;;  %s2652_s6 = inlined_call_operand.hbm [shape: bf16[32,32], index: 6, kind: input, shape index: {}]   ;;  %s2653_s7 = inlined_call_operand.vmem [shape: f32[1,32], index: 7, kind: input, shape index: {}]   ;;  %s2654_s8 = inlined_call_operand.vmem [shape: f32[1,32], index: 8, kind: input, shape index: {}]   ;;  %s2655_s9 = inlined_call_operand.vmem [shape: f32[1,32], index: 9, kind: input, shape index: {}]   ;;  %s2656_s10 = inlined_call_operand.vmem [shape: f32[1,32], index: 10, kind: input, shape index: {}]   ;;  %s2657_s11 = inlined_call_operand.hbm [shape: f32[2,8,32], index: 11, kind: output, shape index: {0}]   ;;  %s2658_s12 = inlined_call_operand.hbm [shape: f32[2,4,8,8], index: 12, kind: output, shape index: {1}]  }
   0x1   :  { %2686 = sst [smem:[#allocation28_spill]] %s2647_s1 }
   0x2   :  { %2687 = sst [smem:[#allocation29_spill]] %s2649_s3 }
   0x3   :  { %2688 = sst [smem:[#allocation30_spill]] %s2651_s5 }
   0x4   :  { %2689 = sst [smem:[#allocation31_spill]] %s2655_s9 }
   0x5   :  { %2690 = sst [smem:[#allocation32_spill]] %s2656_s10 }
   0x6   :  { %2691 = sst [smem:[#allocation33_spill]] %s2657_s11 }
   0x7   :  { %2692 = sst [smem:[#allocation34_spill]] %s2658_s12 }
   0x8   :  { %18 = vsyncpa [#allocation3], 0 }
   0x9   :  { %20 = vsyncpa [#allocation3 + $0x1], 0 }
   0xa   :  { %21 = vsyncpa [#allocation6], 0 }
   0xb   :  { %23 = vsyncpa [#allocation6 + $0x1], 0 }
   0xc   :  { %24 = vsyncpa [#allocation9], 0 }
   0xd   :  { %25 = vsyncpa [#allocation12], 0 }
   0xe   :  { %26 = vsyncpa [#allocation4], 0 }
   0xf   :  { %28 = vsyncpa [#allocation4 + $0x1], 0 }
  0x10   :  { %29 = vsyncpa [#allocation15], 0 }
  0x11   :  { %31 = vsyncpa [#allocation15 + $0x1], 0  ;;  %s2166_s21 = smov 0   ;;  %s2168_s22 = smov 0  }
  0x12   :  { %s2170_s23 = smov 0   ;;  %s2172_s24 = smov 0  }
  0x13 LB: > { %2693 = sst [smem:[#allocation22_spill]] %s2068_s21  ;;  %s2187_s25 = sadd.s32 4294967295, %s2080_s24   ;;  %s2080_s24 = sphi %s2172_s24, %s2736_s24   ;;  %s2076_s23 = sphi %s2170_s23, %s2740_s23   ;;  %s2072_s22 = sphi %s2168_s22, %s2739_s22   ;;  %s2068_s21 = sphi %s2166_s21, %s2738_s21  }
  0x14   : > { %2694 = sst [smem:[#allocation23_spill]] %s2080_s24  ;;  %s1505_s26 = sadd.s32 4294967294, %s2080_s24  }
  0x15   : > { %p57_p0 = scmp.ne.s32.totalorder %s2072_s22, %s2068_s21  ;;  %p2662_p1 = scmp.eq.s32.totalorder %s2187_s25, 0 }
  0x16   : > { %p307_p3 = scmp.eq.s32.totalorder %s1505_s26, 1  ;;  %p1506_p5 = scmp.ge.s32.totalorder %s2080_s24, 1 }
  0x17   : > { %p2196_p4 = por %p2662_p1, %p57_p0  ;;  %p340_p7 = scmp.lt.s32.totalorder %s2080_s24, 3 }
  0x18   : > { %p2201_p6 = por %p307_p3, %p57_p0  ;;  %s2082_s30 = smov [#allocation8]  }
  0x19   : > { %s2695_s27 = scalar_select %p2196_p4, 1, 0 }
  0x1a   : > { %s2696_s28 = scalar_select %p2201_p6, 1, 0 }
  0x1b   : > { %p2206_p8 = pnand %p1506_p5, %p340_p7  ;;  %s352_s13 = sshll.u32 %s2082_s30, 4  ;;  %s2210_s13 = int_to_ptr.vmem [resolvable:$true] %s352_s13 }
  0x1c   : > { %2697 = sst [smem:[#allocation24_spill]] %s2696_s28  ;;  %s2222_s15 = sadd.s32 1, %s2080_s24  }
  0x1d   : > { %s2698_s29 = scalar_select %p2206_p8, 1, 0 }
  0x1e   : > { %p1691_p9 = pneg %p2206_p8  ;;  %2700 = sst [smem:[#allocation25_spill]] %s2222_s15 }
  0x1f   : > { %s44_s16 = sadd.s32 1, %s2076_s23  ;;  %s41_s17 = ssub.s32 %s2080_s24, %s2222_s15 }
  0x20   : > { %p2217_p11 = pnand %p1691_p9, %p2662_p1  ;;  %s2701_s3 = sld [smem:[#allocation29_spill]] }
  0x22   : > { %s2699_s14 = scalar_select %p2217_p11, 1, 0 }
  0x23   : > { %p2235_p13 = pneg %p2217_p11 }
  0x25   : > { %s2702_s28 = scalar_select %p2235_p13, 1, 0 }
  0x26   : > { %s1796_s20 = scalar_lea.hbm %s2701_s3, 256 }
  0x27   : > { %p1797_p12 = scmp.ne.s32.totalorder %s2701_s3, %s1796_s20  ;;  %p1803_p5 = scmp.lt.u32.totalorder %s1796_s20, %s2701_s3 }
  0x29   : > { %p1799_p0 = pnand %p2235_p13, %p1797_p12 }
  0x2b   : > { %p1800_p3 = pneg %p1799_p0 }
  0x2d   : > { %p1805_p7 = pnand %p1803_p5, %p1800_p3 }
  0x2f   : > { %1808 = shalt.err (!%p1805_p7)
}
  0x30   : > { %s1809_s18 = scalar_lea.vmem %s2210_s13, 256  ;;  %p1817_p2 = scmp.lt.s32.totalorder %s2210_s13, %s2210_s13 }
  0x31   : > { %p1810_p9 = scmp.ne.s32.totalorder %s2210_s13, %s1809_s18  ;;  %p1818_p6 = scmp.lt.s32.totalorder %s1809_s18, %s1809_s18 }
  0x33   : > { %p1812_p10 = pnand %p1810_p9, %p2235_p13  ;;  %p1819_p12 = por %p1818_p6, %p1817_p2 }
  0x35   : > { %p1813_p1 = pneg %p1812_p10 }
  0x37   : > { %p1820_p0 = pnand %p1819_p12, %p1813_p1 }
  0x39   : > { %1823 = shalt.err (!%p1820_p0)
}
  0x3a   : > { %s2665_s19 = smov 64   ;;  %s2667_s11 = smov 4  }
  0x3b   : > { %1694 = dma.hbm_to_vmem [thread:$0]  (!%p2217_p11), %s2701_s3, 256, %s2210_s13, [#allocation9], %s2665_s19, %s2665_s19, %s2667_s11  }
  0x3c   : > { %p42_p1 = scmp.eq.s32.totalorder %s41_s17, 0  ;;  %p51_p2 = scmp.ne.s32.totalorder %s2076_s23, %s2072_s22 }
  0x3d   : > { %p52_p6 = scmp.eq.s32.totalorder %s2080_s24, 0  ;;  %p1721_p10 = scmp.lt.s32.totalorder %s2080_s24, 2 }
  0x3e   : > { %s2264_s26 = scalar_select %p42_p1, %s2076_s23, %s44_s16  }
  0x3f   : > { %p53_p3 = por %p52_p6, %p51_p2  ;;  %p2704_p5 = scmp.eq.s32.totalorder %s2187_s25, 1 }
  0x40   : > { %2703 = sst [smem:[#allocation26_spill]] %s2264_s26  ;;  %s2669_s18 = sand.u32 1, %s2076_s23  }
  0x41   : > { %p2268_p7 = por %p2704_p5, %p51_p2  ;;  %s2274_s15 = sshll.u32 %s2080_s24, 7 }
  0x42   : > { %s2278_s10 = sshll.u32 %s2669_s18, 3  ;;  %p2280_p9 = pnand %p1721_p10, %p53_p3 }
  0x43   : > { %s2705_s30 = scalar_select %p2268_p7, 1, 0 }
  0x44   : > { %s2707_s13 = scalar_select %p2280_p9, 1, 0 }
  0x45   : > { %2706 = sst [smem:[#allocation27_spill]] %s2705_s30  ;;  %s425_s16 = sand.u32 1, %s2080_s24  }
  0x46   : > { %s2708_s1 = sld [smem:[#allocation28_spill]]  ;;  %s429_s19 = scalar_lea.vmem [#allocation5], %s2278_s10 }
  0x47   : > { %s436_s11 = sshll.u32 %s429_s19, 4  ;;  %s2294_s18 = scalar_lea.sflag [#allocation6], %s425_s16  ;;  %s2292_s11 = int_to_ptr.vmem [resolvable:$true] %s436_s11 }
  0x48   : > { %p2300_p0 = pneg %p2280_p9 }
  0x4a   : > { %s2709_s26 = scalar_select %p2300_p0, 1, 0 }
  0x4c   : > { %s2289_s20 = scalar_lea.hbm %s2708_s1, %s2274_s15  ;;  %s1829_s24 = scalar_lea.hbm %s2708_s1, 256 }
  0x4d   : > { %s1824_s3 = scalar_lea.hbm %s2289_s20, 128  ;;  %p1830_p6 = scmp.lt.u32.totalorder %s2289_s20, %s2708_s1 }
  0x4e   : > { %p1825_p12 = scmp.ne.s32.totalorder %s2289_s20, %s1824_s3  ;;  %p1831_p10 = scmp.lt.u32.totalorder %s1829_s24, %s1824_s3 }
  0x4f   : > { %p1833_p5 = scmp.lt.u32.totalorder %s1824_s3, %s2289_s20 }
  0x50   : > { %p1827_p1 = pnand %p2300_p0, %p1825_p12  ;;  %p1832_p3 = por %p1831_p10, %p1830_p6 }
  0x52   : > { %p1828_p2 = pneg %p1827_p1  ;;  %p1834_p7 = por %p1833_p5, %p1832_p3 }
  0x54   : > { %p1835_p4 = pnand %p1834_p7, %p1828_p2 }
  0x56   : > { %1838 = shalt.err (!%p1835_p4)
}
  0x57   : > { %s1839_s16 = scalar_lea.vmem %s2292_s11, 128  ;;  %s2085_s17 = smov [#allocation5]  }
  0x58   : > { %p1840_p12 = scmp.ne.s32.totalorder %s2292_s11, %s1839_s16  ;;  %s1844_s21 = sshll.u32 %s2085_s17, 4  ;;  %s1845_s21 = int_to_ptr.vmem [resolvable:$false] %s1844_s21 }
  0x59   : > { %s1846_s12 = scalar_lea.vmem %s1845_s21, 256  ;;  %p1847_p11 = scmp.lt.s32.totalorder %s2292_s11, %s1845_s21 }
  0x5a   : > { %p1842_p1 = pnand %p1840_p12, %p2300_p0  ;;  %p1848_p13 = scmp.lt.s32.totalorder %s1846_s12, %s1839_s16 }
  0x5c   : > { %p1843_p8 = pneg %p1842_p1  ;;  %p1849_p6 = por %p1848_p13, %p1847_p11 }
  0x5e   : > { %p1850_p10 = pnand %p1849_p6, %p1843_p8 }
  0x60   : > { %1853 = shalt.err (!%p1850_p10)
}
  0x61   : > { %1707 = dma.hbm_to_vmem [thread:$0]  (!%p2280_p9), %s2289_s20, 128, %s2292_s11, %s2294_s18  }
  0x62   : > { %s2086_s3 = smov [#allocation10]   ;;  %s2087_s19 = smov [#allocation11]  }
  0x63   : > { %s365_s24 = sshll.u32 %s2086_s3, 4  ;;  %s381_s1 = sshll.u32 %s2087_s19, 4  ;;  %s366_s24 = int_to_ptr.vmem [resolvable:$true] %s365_s24  ;;  %s382_s1 = int_to_ptr.vmem [resolvable:$true] %s381_s1 }
  0x64   : > { %s1854_s21 = scalar_lea.hbm %s2650_s4, 256  ;;  %p2710_p8 = scmp.ne.s32.totalorder %s2702_s28, 0 }
  0x65   : > { %p1855_p4 = scmp.ne.s32.totalorder %s2650_s4, %s1854_s21  ;;  %p1861_p7 = scmp.lt.u32.totalorder %s1854_s21, %s2650_s4 }
  0x67   : > { %p1857_p11 = pnand %p1855_p4, %p2710_p8 }
  0x69   : > { %p1858_p13 = pneg %p1857_p11 }
  0x6b   : > { %p1863_p2 = pnand %p1861_p7, %p1858_p13 }
  0x6d   : > { %1866 = shalt.err (!%p1863_p2)
}
  0x6e   : > { %s1867_s11 = scalar_lea.vmem %s366_s24, 256  ;;  %p1875_p1 = scmp.lt.s32.totalorder %s366_s24, %s366_s24 }
  0x6f   : > { %p1868_p3 = scmp.ne.s32.totalorder %s366_s24, %s1867_s11  ;;  %p1876_p6 = scmp.lt.s32.totalorder %s1867_s11, %s1867_s11 }
  0x71   : > { %p1870_p5 = pnand %p1868_p3, %p2710_p8  ;;  %p1877_p10 = por %p1876_p6, %p1875_p1 }
  0x73   : > { %p1871_p12 = pneg %p1870_p5 }
  0x75   : > { %p1878_p9 = pnand %p1877_p10, %p1871_p12 }
  0x77   : > { %1881 = shalt.err (!%p1878_p9)
}
  0x78   : > { %p2711_p4 = scmp.ne.s32.totalorder %s2699_s14, 0  ;;  %s2712_s30 = smov 4  }
  0x79   : > { %s2713_s20 = smov 64   ;;  %s1882_s17 = scalar_lea.hbm %s2652_s6, 256 }
  0x7a   : > { %1697 = dma.hbm_to_vmem [thread:$0]  (!%p2711_p4), %s2650_s4, 256, %s366_s24, [#allocation9], %s2713_s20, %s2713_s20, %s2712_s30  }
  0x7b   : > { %p1883_p11 = scmp.ne.s32.totalorder %s2652_s6, %s1882_s17  ;;  %p1889_p7 = scmp.lt.u32.totalorder %s1882_s17, %s2652_s6 }
  0x7d   : > { %p1885_p9 = pnand %p1883_p11, %p2710_p8 }
  0x7f   : > { %p1886_p13 = pneg %p1885_p9 }
  0x81   : > { %p1891_p2 = pnand %p1889_p7, %p1886_p13 }
  0x83   : > { %1894 = shalt.err (!%p1891_p2)
}
  0x84   : > { %s1895_s5 = scalar_lea.vmem %s382_s1, 256  ;;  %p1903_p1 = scmp.lt.s32.totalorder %s382_s1, %s382_s1 }
  0x85   : > { %p1896_p3 = scmp.ne.s32.totalorder %s382_s1, %s1895_s5  ;;  %p1904_p6 = scmp.lt.s32.totalorder %s1895_s5, %s1895_s5 }
  0x87   : > { %p1898_p5 = pnand %p1896_p3, %p2710_p8  ;;  %p1905_p10 = por %p1904_p6, %p1903_p1 }
  0x89   : > { %p1899_p12 = pneg %p1898_p5 }
  0x8b   : > { %p1906_p0 = pnand %p1905_p10, %p1899_p12 }
  0x8d   : > { %1909 = shalt.err (!%p1906_p0)
}
  0x8e   : > { %1700 = dma.hbm_to_vmem [thread:$0]  (!%p2711_p4), %s2652_s6, 256, %s382_s1, [#allocation12], %s2713_s20, %s2713_s20, %s2712_s30  }
  0x8f   : > { %s2370_s19 = scalar_lea.hbm %s2646_s0, %s2274_s15  ;;  %s411_s14 = scalar_lea.vmem [#allocation2], %s2278_s10 }
  0x90   : > { %s418_s17 = sshll.u32 %s411_s14, 4  ;;  %s2379_s12 = scalar_lea.hbm %s2648_s2, %s2274_s15  ;;  %s2373_s17 = int_to_ptr.vmem [resolvable:$true] %s418_s17 }
  0x91   : > { %s2714_s11 = sand.u32 1, %s2076_s23   ;;  %s1910_s30 = scalar_lea.hbm %s2370_s19, 128 }
  0x92   : > { %s408_s1 = scalar_lea.sflag [#allocation3], %s2714_s11  ;;  %p1911_p0 = scmp.ne.s32.totalorder %s2370_s19, %s1910_s30 }
  0x93   : > { %p2715_p8 = scmp.ne.s32.totalorder %s2709_s26, 0  ;;  %s1915_s24 = scalar_lea.hbm %s2646_s0, 256 }
  0x94   : > { %p1916_p9 = scmp.lt.u32.totalorder %s2370_s19, %s2646_s0  ;;  %p1917_p13 = scmp.lt.u32.totalorder %s1915_s24, %s1910_s30 }
  0x95   : > { %p1913_p4 = pnand %p1911_p0, %p2715_p8  ;;  %p1919_p2 = scmp.lt.u32.totalorder %s1910_s30, %s2370_s19 }
  0x96   : > { %p1918_p7 = por %p1917_p13, %p1916_p9 }
  0x97   : > { %p1914_p11 = pneg %p1913_p4 }
  0x98   : > { %p1920_p3 = por %p1919_p2, %p1918_p7 }
  0x9a   : > { %p1921_p5 = pnand %p1920_p3, %p1914_p11 }
  0x9c   : > { %1924 = shalt.err (!%p1921_p5)
}
  0x9d   : > { %s1925_s15 = scalar_lea.vmem %s2373_s17, 128  ;;  %s2088_s3 = smov [#allocation2]  }
  0x9e   : > { %p1926_p12 = scmp.ne.s32.totalorder %s2373_s17, %s1925_s15  ;;  %s1930_s14 = sshll.u32 %s2088_s3, 4  ;;  %s1931_s14 = int_to_ptr.vmem [resolvable:$false] %s1930_s14 }
  0x9f   : > { %s1932_s21 = scalar_lea.vmem %s1931_s14, 256  ;;  %p1933_p10 = scmp.lt.s32.totalorder %s2373_s17, %s1931_s14 }
  0xa0   : > { %p1928_p1 = pnand %p1926_p12, %p2715_p8  ;;  %p1934_p0 = scmp.lt.s32.totalorder %s1932_s21, %s1925_s15 }
  0xa2   : > { %p1929_p6 = pneg %p1928_p1  ;;  %p1935_p4 = por %p1934_p0, %p1933_p10 }
  0xa4   : > { %p1936_p9 = pnand %p1935_p4, %p1929_p6 }
  0xa6   : > { %1939 = shalt.err (!%p1936_p9)
}
  0xa7   : > { %p2716_p11 = scmp.ne.s32.totalorder %s2707_s13, 0  ;;  %s447_s16 = scalar_lea.vmem [#allocation7], %s2278_s10 }
  0xa8   : > { %s454_s11 = sshll.u32 %s447_s16, 4  ;;  %s1940_s30 = scalar_lea.hbm %s2379_s12, 128  ;;  %s455_s11 = int_to_ptr.vmem [resolvable:$true] %s454_s11 }
  0xa9   : > { %1704 = dma.hbm_to_vmem [thread:$0]  (!%p2716_p11), %s2370_s19, 128, %s2373_s17, %s408_s1  }
  0xaa   : > { %p1941_p13 = scmp.ne.s32.totalorder %s2379_s12, %s1940_s30  ;;  %s1945_s24 = scalar_lea.hbm %s2648_s2, 256 }
  0xab   : > { %p1946_p3 = scmp.lt.u32.totalorder %s2379_s12, %s2648_s2  ;;  %p1947_p5 = scmp.lt.u32.totalorder %s1945_s24, %s1940_s30 }
  0xac   : > { %p1943_p7 = pnand %p1941_p13, %p2715_p8  ;;  %p1949_p1 = scmp.lt.u32.totalorder %s1940_s30, %s2379_s12 }
  0xad   : > { %p1948_p12 = por %p1947_p5, %p1946_p3 }
  0xae   : > { %p1944_p2 = pneg %p1943_p7 }
  0xaf   : > { %p1950_p6 = por %p1949_p1, %p1948_p12 }
  0xb1   : > { %p1951_p10 = pnand %p1950_p6, %p1944_p2 }
  0xb3   : > { %1954 = shalt.err (!%p1951_p10)
}
  0xb4   : > { %s1955_s10 = scalar_lea.vmem %s455_s11, 128  ;;  %s2089_s19 = smov [#allocation7]  }
  0xb5   : > { %p1956_p0 = scmp.ne.s32.totalorder %s455_s11, %s1955_s10  ;;  %s1960_s17 = sshll.u32 %s2089_s19, 4  ;;  %s1961_s17 = int_to_ptr.vmem [resolvable:$false] %s1960_s17 }
  0xb6   : > { %s1962_s1 = scalar_lea.vmem %s1961_s17, 256  ;;  %p1963_p13 = scmp.lt.s32.totalorder %s455_s11, %s1961_s17 }
  0xb7   : > { %p1958_p4 = pnand %p1956_p0, %p2715_p8  ;;  %p1964_p7 = scmp.lt.s32.totalorder %s1962_s1, %s1955_s10 }
  0xb9   : > { %p1959_p9 = pneg %p1958_p4  ;;  %p1965_p11 = por %p1964_p7, %p1963_p13 }
  0xbb   : > { %p1966_p3 = pnand %p1965_p11, %p1959_p9 }
  0xbd   : > { %1969 = shalt.err (!%p1966_p3)
}
  0xbe   : > { %p2717_p5 = scmp.ne.s32.totalorder %s2707_s13, 0  ;;  %p2718_p2 = scmp.ne.s32.totalorder %s2698_s29, 0 }
  0xbf   : > { %s2426_s26 = sand.u32 (!%p2718_p2), 1, %s2072_s22   ;;  %p2719_p8 = scmp.ne.s32.totalorder (!%p2718_p2), %s2695_s27, 0 }
  0xc0   : > { %1710 = dma.hbm_to_vmem [thread:$0]  (!%p2717_p5), %s2379_s12, 128, %s455_s11, %s2294_s18  }
  0xc1   : > { %463 = sbr.rel (%p2718_p2) target bundleno = 1662 (0x67e), region = 64  ;;  %s2429_s15 = sshll.u32 (!%p2718_p2), %s2426_s26, 3 }
  0xc2   : > { %s466_s3 = scalar_lea.sflag (!%p2718_p2), [#allocation3], %s2426_s26  ;;  %s469_s14 = scalar_lea.vmem (!%p2718_p2), [#allocation2], %s2429_s15 }
  0xc8   : > { %2043 = dma.done.wait (%p2719_p8), %s466_s3, 128  }
  0xc9   : > { %2045 = vsyncadd (%p2719_p8), %s466_s3, 4294967168  ;;  %s474_s29 = sand.u32 1, %s2187_s25   ;;  %s478_s13 = scalar_lea.vmem [#allocation5], %s2429_s15 }
  0xca   : > { %s475_s18 = scalar_lea.sflag [#allocation6], %s474_s29 }
  0xcb   : > { %2047 = dma.done.wait (%p2719_p8), %s475_s18, 256  }
  0xcc   : > { %2049 = vsyncadd (%p2719_p8), %s475_s18, 4294967040  ;;  %s487_s12 = scalar_lea.vmem [#allocation7], %s2429_s15  ;;  %p2720_p11 = scmp.eq.s32.totalorder %s2187_s25, 0 }
  0xce   : > { %2051 = dma.done.wait (%p2720_p11), [#allocation9], 512   ;;  %p2721_p12 = pmov %p2720_p11 }
  0xcf   : > { %p2722_p1 = pmov %p2720_p11 }
  0xd0   : > { %2053 = vsyncadd (%p2721_p12), [#allocation9], 4294966784 }
  0xd1   : > { %2055 = dma.done.wait (%p2722_p1), [#allocation12], 256   ;;  %p2723_p6 = pmov %p2722_p1 }
  0xd2   : > { %v2090_v0 = vmov 0.0   ;;  %vm2091_vm0 = vmmov 0   ;;  %v1772_v1 = vld [vmem:[#allocation10] sm:$0xff]   ;;  %v1773_v2 = vld [vmem:[#allocation8] sm:$0xff]   ;;  %v1774_v3 = vld [vmem:[#allocation10 + $0x8] sm:$0xff]   ;;  %vm581_vm1 = vcmask 261120  }
  0xd3   : > { %2057 = vsyncadd (%p2723_p6), [#allocation12], 4294967040  ;;  %1597 = vmatprep.subr.bf16.mxu1 %v2090_v0  ;;  %1589 = vmatprep.subr.bf16.mxu0 %v2090_v0  ;;  %v1775_v4 = vld [vmem:[#allocation8 + $0x8] sm:$0xff]   ;;  %v556_v6 = vld [vmem:[%s469_s14] sm:$0xff]  ;;  %vm765_vm2 = vcmask 64512   ;;  %s2092_s30 = smov 112  }
  0xd4   : > { %1601 = vmatprep.mubr.msk.bf16.mxu1 %vm2091_vm0, %v2090_v0  ;;  %1593 = vmatprep.mubr.msk.bf16.mxu0 %vm2091_vm0, %v2090_v0  ;;  %v626_v5 = vld [vmem:[%s478_s13] sm:$0xff]  ;;  %v557_v8 = vpack.c.bf16 %v556_v6, %v556_v6  ;;  %v1530_v9 = vld [vmem:[%s2654_s8] ss:$0 sm:$0xff]  ;;  %s2093_s20 = smov 120   ;;  %s2094_s5 = smov 104   ;;  %vm828_vm3 = vcmask 1043456  }
  0xd5   : > { %1598 = vmatpush3.bf16.msra.mxu1 %v1772_v1  ;;  %1590 = vmatpush3.bf16.msra.mxu0 %v1773_v2  ;;  %v627_v7 = vpack.c.bf16 %v626_v5, %v626_v5  ;;  %v1526_v10 = vld [vmem:[%s2653_s7] ss:$0 sm:$0xff]  ;;  %s2724_s28 = sld [smem:[#allocation30_spill]]  ;;  %s2725_s3 = sld [smem:[#allocation31_spill]]  ;;  %vm1224_vm4 = vcmask 130048   ;;  %vm1226_vm5 = vcmask 195584  }
  0xd6   : > { %1599 = vmatprep.subr.bf16.mxu1 %v2090_v0  ;;  %1591 = vmatprep.subr.bf16.mxu0 %v2090_v0  ;;  %v694_v27 = vld [vmem:[%s487_s12] sm:$0xff]  ;;  %s1525_s14 = sshll.u32 %s2426_s26, 5  ;;  %s2095_s18 = smov 8  }
  0xd7   : > { %v695_v28 = vpack.c.bf16 %v694_v27, %v694_v27  ;;  %s2530_s29 = scalar_lea.vmem [#allocation14], %s1525_s14  ;;  %s2096_s13 = smov 16  }
  0xd8   : > { %s2097_s12 = smov 24   ;;  %s2726_s27 = sld [smem:[#allocation27_spill]] }
  0xd9   : > { %1600 = vmatpush3.bf16.msra.mxu1 %v1774_v3  ;;  %1592 = vmatpush3.bf16.msra.mxu0 %v1775_v4  ;;  %s1560_s21 = sshll.u32 %s2187_s25, 9  ;;  %s1328_s16 = sshll.u32 %s2530_s29, 4  ;;  %s2566_s16 = int_to_ptr.vmem [resolvable:$true] %s1328_s16 }
  0xda   : > { %1613 = vmatprep.subr.bf16.mxu1 %v2090_v0  ;;  %1605 = vmatprep.subr.bf16.mxu0 %v2090_v0  ;;  %s1302_s24 = scalar_lea.sflag [#allocation15], %s2426_s26  ;;  %s1970_s9 = scalar_lea.vmem %s2566_s16, 512 }
  0xdb   : > { %v1776_v25 = vld [vmem:[%s2724_s28] sm:$0xff]   ;;  %v1777_v26 = vld [vmem:[%s2724_s28 + $0x8] sm:$0xff]   ;;  %p1971_p10 = scmp.ne.s32.totalorder %s2566_s16, %s1970_s9  ;;  %s2098_s10 = smov [#allocation14]  }
  0xdc   : > { %1602 = vmatmul.mubr.msk.bf16.vlgmr.msra.gmra.mrb[0].mxu1 %vm581_vm1, %v627_v7  ;;  %1594 = vmatmul.mubr.msk.bf16.vlgmr.msra.gmra.mrb[0].mxu0 %vm581_vm1, %v557_v8  ;;  %v1534_v43 = vld [vmem:[%s2725_s3] ss:$0 sm:$0xff]  ;;  %s1974_s19 = sshll.u32 %s2098_s10, 4  ;;  %s1975_s19 = int_to_ptr.vmem [resolvable:$false] %s1974_s19 }
  0xdd   : > { %1615 = vmatprep.mubr.msk.bf16.mxu1 %vm2091_vm0, %v2090_v0  ;;  %1609 = vmatprep.mubr.msk.bf16.mxu0 %vm2091_vm0, %v2090_v0  ;;  %s1976_s17 = scalar_lea.vmem %s1975_s19, 1024  ;;  %p1977_p13 = scmp.lt.s32.totalorder %s2566_s16, %s1975_s19 }
  0xde   : > { %1606 = vmatpush3.bf16.msra.mxu0 %v1776_v25  ;;  %p2728_p0 = scmp.ne.s32.totalorder %s2726_s27, 0  ;;  %p1978_p7 = scmp.lt.s32.totalorder %s1976_s17, %s1970_s9 }
  0xdf   : > { %1607 = vmatprep.subr.bf16.mxu0 %v2090_v0 }
  0xe0   : > { %p1972_p4 = pnand %p1971_p10, %p2728_p0  ;;  %p1979_p3 = por %p1978_p7, %p1977_p13 }
  0xe2   : > { %1608 = vmatpush3.bf16.msra.mxu0 %v1777_v26  ;;  %p1973_p9 = pneg %p1972_p4 }
  0xe3   : > { %1619 = vmatprep.subr.bf16.mxu0 %v2090_v0 }
  0xe4   : > { %p1980_p5 = pnand %p1979_p3, %p1973_p9 }
  0xe5   : > { %1610 = vmatmul.mubr.msk.bf16.vlgmr.msra.gmra.mrb[4].mxu0 %vm581_vm1, %v695_v28 }
  0xe6   : > { %1621 = vmatprep.mubr.msk.bf16.mxu0 %vm2091_vm0, %v2090_v0 }
 0x1af   : > { %v688_v11 = vpop.f32.mrb[0].mxu1  ;;  %v619_v14 = vpop.f32.mrb[0].mxu0 }
 0x1b0   : > { %v689_v12 = vadd.f32 %v1530_v9, %v688_v11  ;;  %v1603_v13 = vpop.f32.mrb[1].mxu1  ;;  %v620_v15 = vadd.f32 %v1526_v10, %v619_v14  ;;  %v1595_v17 = vpop.f32.mrb[1].mxu0 }
 0x1b1   : > { %v691_v16 = vpop.f32.mrb[2].mxu1  ;;  %v622_v20 = vpop.f32.mrb[2].mxu0 }
 0x1b2   : > { %v763_v18 = vpack.c.bf16 %v689_v12, %v689_v12  ;;  %v1604_v19 = vpop.f32.mrb[3].mxu1  ;;  %v625_v21 = vmul.f32 0.35355338, %v620_v15  ;;  %v1596_v22 = vpop.f32.mrb[3].mxu0 }
 0x1b4   : > { %989 = vrot.lane.b32.xlu1 %v763_v18, %s2092_s30  ;;  %876 = vrot.lane.b32.xlu0 %v763_v18, %s2093_s20  ;;  %v770_v23 = vsel %vm765_vm2, %v763_v18, 0  ;;  %v762_v24 = vpack.c.bf16 %v625_v21, %v625_v21 }
 0x1b5   : > { %1614 = vmatpush3.bf16.xpose.msra.mxu1 %v770_v23 }
 0x1b6   : > { %1625 = vmatprep.subr.bf16.mxu1 %v2090_v0 }
 0x1b8   : > { %987 = vrot.lane.b32.xlu1 %v762_v24, %s2092_s30  ;;  %873 = vrot.lane.b32.xlu0 %v762_v24, %s2093_s20  ;;  %v756_v44 = vpop.f32.mrb[4].mxu0 }
 0x1b9   : > { %v757_v45 = vadd.f32 %v1534_v43, %v756_v44  ;;  %v1611_v46 = vpop.f32.mrb[5].mxu0 }
 0x1ba   : > { %v759_v47 = vpop.f32.mrb[6].mxu0 }
 0x1bb   : > { %v764_v48 = vpack.c.bf16 %v757_v45, %v757_v45  ;;  %v1612_v49 = vpop.f32.mrb[7].mxu0 }
 0x1bc   : > { %1099 = vrot.lane.b32.xlu1 %v762_v24, %s2094_s5  ;;  %1101 = vrot.lane.b32.xlu0 %v763_v18, %s2094_s5  ;;  %v1778_v49 = vld [vmem:[#allocation11] sm:$0xff]  }
 0x1bd   : > { %1616 = vmatmul.mubr.msk.bf16.vlgmr.msra.gmra.mrb[4].mxu1 %vm765_vm2, %v762_v24  ;;  %v830_v50 = vsel %vm828_vm3, %v764_v48, 0 }
 0x1be   : > { %1627 = vmatprep.mubr.msk.bf16.mxu1 %vm2091_vm0, %v2090_v0  ;;  %1620 = vmatpush3.bf16.msra.mxu0 %v830_v50 }
 0x1bf   : > { %1631 = vmatprep.subr.bf16.mxu0 %v2090_v0 }
 0x226   : > { %v877_v29 = vpop.permute.xlu0 %876  ;;  %v990_v31 = vpop.permute.xlu1 %989 }
 0x227   : > { %v882_v30 = vsel %vm765_vm2, %v877_v29, 0  ;;  %v995_v33 = vsel %vm765_vm2, %v990_v31, 0 }
 0x228   : > { %1626 = vmatpush3.bf16.xpose.msra.mxu1 %v882_v30 }
 0x229   : > { %1637 = vmatprep.subr.bf16.mxu1 %v2090_v0 }
 0x22a   : > { %v874_v32 = vpop.permute.xlu0 %873  ;;  %v988_v35 = vpop.permute.xlu1 %987 }
 0x22e   : > { %v1102_v34 = vpop.permute.xlu0 %1101  ;;  %v1100_v37 = vpop.permute.xlu1 %1099 }
 0x22f   : > { %1628 = vmatmul.mubr.msk.bf16.vlgmr.msra.gmra.mrb[8].mxu1 %vm765_vm2, %v874_v32  ;;  %v1107_v36 = vsel %vm765_vm2, %v1102_v34, 0 }
 0x230   : > { %1638 = vmatpush3.bf16.xpose.msra.mxu1 %v995_v33  ;;  %1639 = vmatprep.mubr.msk.bf16.mxu1 %vm2091_vm0, %v2090_v0 }
 0x231   : > { %1649 = vmatprep.subr.bf16.mxu1 %v2090_v0 }
 0x237   : > { %1640 = vmatmul.mubr.msk.bf16.vlgmr.msra.gmra.mrb[12].mxu1 %vm765_vm2, %v988_v35 }
 0x238   : > { %1650 = vmatpush3.bf16.xpose.msra.mxu1 %v1107_v36  ;;  %1651 = vmatprep.mubr.msk.bf16.mxu1 %vm2091_vm0, %v2090_v0 }
 0x239   : > { %1661 = vmatprep.subr.bf16.mxu1 %v2090_v0 }
 0x23f   : > { %1652 = vmatmul.mubr.msk.bf16.vlgmr.msra.gmra.mrb[16].mxu1 %vm765_vm2, %v1100_v37 }
 0x240   : > { %1665 = vmatprep.mubr.msk.bf16.mxu1 %vm2091_vm0, %v2090_v0  ;;  %1662 = vmatpush3.bf16.msra.mxu1 %v1778_v49 }
 0x241   : > { %1663 = vmatprep.subr.bf16.mxu1 %v2090_v0 }
 0x290   : > { %v806_v38 = vpop.f32.mrb[4].mxu1 }
 0x291   : > { %v1617_v39 = vpop.f32.mrb[5].mxu1  ;;  %v812_v40 = vsel %vm765_vm2, %v806_v38, -inf }
 0x292   : > { %813 = vmax.xlane.f32.xlu0 %v812_v40  ;;  %v809_v41 = vpop.f32.mrb[6].mxu1 }
 0x293   : > { %v1618_v42 = vpop.f32.mrb[7].mxu1 }
 0x302   : > { %v918_v51 = vpop.f32.mrb[8].mxu1 }
 0x303   : > { %v1629_v52 = vpop.f32.mrb[9].mxu1  ;;  %v924_v53 = vsel %vm765_vm2, %v918_v51, -inf }
 0x304   : > { %925 = vmax.xlane.f32.xlu1 %v924_v53  ;;  %v921_v54 = vpop.f32.mrb[10].mxu1 }
 0x305   : > { %v1630_v55 = vpop.f32.mrb[11].mxu1  ;;  %v1779_v54 = vld [vmem:[#allocation11 + $0x8] sm:$0xff]  }
 0x306   : > { %1664 = vmatpush3.bf16.msra.mxu1 %v1779_v54 }
 0x30a   : > { %v1031_v56 = vpop.f32.mrb[12].mxu1 }
 0x30b   : > { %v1641_v57 = vpop.f32.mrb[13].mxu1  ;;  %v1037_v58 = vsel %vm765_vm2, %v1031_v56, -inf }
 0x30c   : > { %1038 = vmax.xlane.f32.xlu0 %v1037_v58  ;;  %v1034_v59 = vpop.f32.mrb[14].mxu1 }
 0x30d   : > { %v1642_v60 = vpop.f32.mrb[15].mxu1 }
 0x312   : > { %v1143_v61 = vpop.f32.mrb[16].mxu1 }
 0x313   : > { %v1653_v62 = vpop.f32.mrb[17].mxu1  ;;  %v1149_v63 = vsel %vm765_vm2, %v1143_v61, -inf }
 0x314   : > { %1150 = vmax.xlane.f32.xlu0 %v1149_v63  ;;  %v1146_v1 = vpop.f32.mrb[18].mxu1 }
 0x315   : > { %v1654_v2 = vpop.f32.mrb[19].mxu1 }
 0x31f   : > { %v814_v3 = vpop.xlane.xlu0 %813 }
 0x320   : > { %v815_v4 = vsub.f32 %v806_v38, %v814_v3 }
 0x322   : > { %v816_v5 = vmul.f32 1.442695, %v815_v4 }
 0x324   : > { %1780 = vpow2.f32 %v816_v5 }
 0x32e   : > { %v1781_v6 = vpop.eup %1780 }
 0x32f   : > { %v818_v7 = vsel %vm765_vm2, %v1781_v6, 0.0 }
 0x330   : > { %819 = vadd.xlane.f32.xlu1 %v818_v7 }
 0x341   : > { %939 = vrot.lane.b32.xlu1 %v764_v48, %s2093_s20  ;;  %s2727_s20 = sld [smem:[#allocation34_spill]] }
 0x391   : > { %v926_v8 = vpop.xlane.xlu1 %925 }
 0x392   : > { %v927_v9 = vsub.f32 %v918_v51, %v926_v8 }
 0x394   : > { %v928_v10 = vmul.f32 1.442695, %v927_v9 }
 0x396   : > { %1782 = vpow2.f32 %v928_v10 }
 0x399   : > { %v1039_v11 = vpop.xlane.xlu0 %1038 }
 0x39a   : > { %v1040_v12 = vsub.f32 %v1031_v56, %v1039_v11 }
 0x39c   : > { %v1041_v13 = vmul.f32 1.442695, %v1040_v12 }
 0x39e   : > { %1784 = vpow2.f32 %v1041_v13 }
 0x3a0   : > { %v1783_v14 = vpop.eup %1782 }
 0x3a1   : > { %v1151_v15 = vpop.xlane.xlu0 %1150  ;;  %v930_v16 = vsel %vm765_vm2, %v1783_v14, 0.0 }
 0x3a2   : > { %v1152_v17 = vsub.f32 %v1143_v61, %v1151_v15  ;;  %931 = vadd.xlane.f32.xlu0 %v930_v16 }
 0x3a4   : > { %v1153_v18 = vmul.f32 1.442695, %v1152_v17 }
 0x3a6   : > { %1786 = vpow2.f32 %v1153_v18 }
 0x3a8   : > { %v1785_v19 = vpop.eup %1784 }
 0x3a9   : > { %v1043_v20 = vsel %vm765_vm2, %v1785_v19, 0.0 }
 0x3aa   : > { %1044 = vadd.xlane.f32.xlu1 %v1043_v20 }
 0x3b0   : > { %v1787_v21 = vpop.eup %1786 }
 0x3b1   : > { %v1155_v22 = vsel %vm765_vm2, %v1787_v21, 0.0 }
 0x3b2   : > { %1156 = vadd.xlane.f32.xlu0 %v1155_v22 }
 0x3bb   : > { %1163 = vrot.lane.b32.xlu1 %v764_v48, %s2094_s5  ;;  %s2564_s5 = scalar_lea.hbm %s2727_s20, %s1560_s21 }
 0x3bd   : > { %v820_v23 = vpop.xlane.xlu1 %819 }
 0x3be   : > { %1788 = vrcp.f32 %v820_v23 }
 0x3c1   : > { %v940_v25 = vpop.permute.xlu1 %939 }
 0x3c2   : > { %v945_v28 = vsel %vm828_vm3, %v940_v25, 0 }
 0x3c8   : > { %v1789_v24 = vpop.eup %1788  ;;  %1051 = vrot.lane.b32.xlu0 %v764_v48, %s2092_s30 }
 0x3c9   : > { %v822_v26 = vmul.f32 %v1789_v24, %v1781_v6 }
 0x3cb   : > { %823 = vst.msk [vmem:[%s2530_s29] sm:$0xff] %vm765_vm2, %v822_v26  ;;  %v824_v27 = vpack.c.bf16 %v822_v26, %v822_v26 }
 0x3cd   : > { %1622 = vmatmul.mubr.msk.bf16.vlgmr.msra.gmra.mrb[8].mxu0 %vm765_vm2, %v824_v27 }
 0x3ce   : > { %1632 = vmatpush3.bf16.msra.mxu0 %v945_v28  ;;  %1633 = vmatprep.mubr.msk.bf16.mxu0 %vm2091_vm0, %v2090_v0 }
 0x3cf   : > { %1643 = vmatprep.subr.bf16.mxu0 %v2090_v0 }
 0x42f   : > { %v932_v29 = vpop.xlane.xlu0 %931 }
 0x430   : > { %1790 = vrcp.f32 %v932_v29 }
 0x437   : > { %v1045_v30 = vpop.xlane.xlu1 %1044 }
 0x438   : > { %1792 = vrcp.f32 %v1045_v30 }
 0x43a   : > { %v1791_v31 = vpop.eup %1790 }
 0x43b   : > { %v934_v32 = vmul.f32 %v1791_v31, %v1783_v14  ;;  %v1164_v39 = vpop.permute.xlu1 %1163 }
 0x43c   : > { %v1169_v41 = vsel %vm828_vm3, %v1164_v39, 0 }
 0x43d   : > { %1541 = vst.msk [vmem:[%s2530_s29 + $0x8] sm:$0xff] %vm765_vm2, %v934_v32  ;;  %v937_v33 = vpack.c.bf16 %v934_v32, %v934_v32 }
 0x43f   : > { %v1157_v34 = vpop.xlane.xlu0 %1156  ;;  %1634 = vmatmul.mubr.msk.bf16.vlgmr.msra.gmra.mrb[12].mxu0 %vm765_vm2, %v937_v33 }
 0x440   : > { %1794 = vrcp.f32 %v1157_v34  ;;  %1645 = vmatprep.mubr.msk.bf16.mxu0 %vm2091_vm0, %v2090_v0 }
 0x442   : > { %v1793_v35 = vpop.eup %1792 }
 0x443   : > { %v1047_v36 = vmul.f32 %v1793_v35, %v1785_v19  ;;  %v1052_v37 = vpop.permute.xlu0 %1051 }
 0x444   : > { %v1057_v38 = vsel %vm828_vm3, %v1052_v37, 0 }
 0x445   : > { %1544 = vst.msk [vmem:[%s2530_s29 + $0x10] sm:$0xff] %vm765_vm2, %v1047_v36  ;;  %1644 = vmatpush3.bf16.msra.mxu0 %v1057_v38  ;;  %v1050_v40 = vpack.c.bf16 %v1047_v36, %v1047_v36 }
 0x446   : > { %1655 = vmatprep.subr.bf16.mxu0 %v2090_v0 }
 0x448   : > { %1646 = vmatmul.mubr.msk.bf16.vlgmr.msra.gmra.mrb[16].mxu0 %vm765_vm2, %v1050_v40 }
 0x449   : > { %1656 = vmatpush3.bf16.msra.mxu0 %v1169_v41  ;;  %1657 = vmatprep.mubr.msk.bf16.mxu0 %vm2091_vm0, %v2090_v0 }
 0x44a   : > { %v1795_v42 = vpop.eup %1794 }
 0x44b   : > { %v1159_v43 = vmul.f32 %v1795_v42, %v1787_v21 }
 0x44d   : > { %1547 = vst.msk [vmem:[%s2530_s29 + $0x18] sm:$0xff] %vm765_vm2, %v1159_v43  ;;  %v1162_v44 = vpack.c.bf16 %v1159_v43, %v1159_v43 }
 0x450   : > { %1658 = vmatmul.mubr.msk.bf16.vlgmr.msra.gmra.mrb[20].mxu0 %vm765_vm2, %v1162_v44 }
 0x4a0   : > { %v866_v45 = vpop.f32.mrb[8].mxu0 }
 0x4a1   : > { %v1623_v46 = vpop.f32.mrb[9].mxu0 }
 0x4a2   : > { %v869_v47 = vpop.f32.mrb[10].mxu0 }
 0x4a3   : > { %v1624_v48 = vpop.f32.mrb[11].mxu0 }
 0x512   : > { %v981_v50 = vpop.f32.mrb[12].mxu0 }
 0x513   : > { %1212 = vrot.lane.b32.xlu1 %v981_v50, %s2095_s18  ;;  %v1635_v51 = vpop.f32.mrb[13].mxu0 }
 0x514   : > { %v984_v52 = vpop.f32.mrb[14].mxu0 }
 0x515   : > { %v1636_v53 = vpop.f32.mrb[15].mxu0 }
 0x51b   : > { %v1093_v55 = vpop.f32.mrb[16].mxu0 }
 0x51c   : > { %1216 = vrot.lane.b32.xlu0 %v1093_v55, %s2096_s13  ;;  %v1647_v56 = vpop.f32.mrb[17].mxu0 }
 0x51d   : > { %v1096_v57 = vpop.f32.mrb[18].mxu0 }
 0x51e   : > { %v1648_v58 = vpop.f32.mrb[19].mxu0 }
 0x523   : > { %v1205_v59 = vpop.f32.mrb[20].mxu0 }
 0x524   : > { %1220 = vrot.lane.b32.xlu1 %v1205_v59, %s2097_s12  ;;  %v1659_v0 = vpop.f32.mrb[21].mxu0 }
 0x525   : > { %v1208_v60 = vpop.f32.mrb[22].mxu0 }
 0x526   : > { %v1660_v61 = vpop.f32.mrb[23].mxu0 }
 0x585   : > { %v1213_v62 = vpop.permute.xlu1 %1212 }
 0x586   : > { %v1223_v1 = vsel %vm765_vm2, %v866_v45, %v1213_v62 }
 0x58e   : > { %v1217_v63 = vpop.permute.xlu0 %1216 }
 0x58f   : > { %v1225_v2 = vsel %vm1224_vm4, %v1223_v1, %v1217_v63 }
 0x596   : > { %v1221_v3 = vpop.permute.xlu1 %1220 }
 0x597   : > { %v1227_v4 = vsel %vm1226_vm5, %v1225_v2, %v1221_v3 }
 0x598   : > { %v1228_v5 = vpack.c.bf16 %v1227_v4, %v1227_v4 }
 0x59a   : > { %1666 = vmatmul.mubr.msk.bf16.vlgmr.msra.gmra.mrb[20].mxu1 %vm581_vm1, %v1228_v5 }
 0x59b   : > { %1983 = shalt.err (!%p1980_p5)
}
 0x59c   : > { %s1984_s1 = scalar_lea.hbm %s2564_s5, 512  ;;  %s1988_s29 = scalar_lea.hbm %s2727_s20, 1024 }
 0x59d   : > { %p1985_p2 = scmp.ne.s32.totalorder %s2564_s5, %s1984_s1  ;;  %p1989_p12 = scmp.lt.u32.totalorder %s2564_s5, %s2727_s20 }
 0x59e   : > { %p1990_p1 = scmp.lt.u32.totalorder %s1988_s29, %s1984_s1  ;;  %p1992_p10 = scmp.lt.u32.totalorder %s1984_s1, %s2564_s5 }
 0x59f   : > { %p1986_p8 = pnand %p1985_p2, %p2728_p0 }
 0x5a0   : > { %p1991_p6 = por %p1990_p1, %p1989_p12 }
 0x5a1   : > { %p1987_p11 = pneg %p1986_p8 }
 0x5a2   : > { %p1993_p4 = por %p1992_p10, %p1991_p6 }
 0x5a4   : > { %p1994_p9 = pnand %p1993_p4, %p1987_p11 }
 0x5a6   : > { %1997 = shalt.err (!%p1994_p9)
}
 0x5a7   : > { %s2099_s21 = smov 128   ;;  %s2729_s9 = sld [smem:[#allocation32_spill]] }
 0x5a8   : > { %1688 = dma.vmem_to_hbm [thread:$0]  (%p2728_p0), %s2566_s16, 512, %s2564_s5, %s1302_s24, %s2099_s21, %s2099_s21, %s2095_s18  }
 0x5a9   : > { %s1555_s10 = sshll.u32 %s2187_s25, 7  ;;  %s547_s19 = scalar_lea.vmem [#allocation13], %s2429_s15 }
 0x5aa   : > { %s1315_s17 = sshll.u32 %s547_s19, 4  ;;  %s2730_s14 = sld [smem:[#allocation33_spill]]  ;;  %s2603_s17 = int_to_ptr.vmem [resolvable:$true] %s1315_s17 }
 0x5ab   : > { %s1297_s25 = scalar_lea.sflag [#allocation4], %s2426_s26  ;;  %s1998_s15 = scalar_lea.vmem %s2603_s17, 128 }
 0x5ac   : > { %p1999_p13 = scmp.ne.s32.totalorder %s2603_s17, %s1998_s15  ;;  %s2100_s18 = smov [#allocation13]  }
 0x5ad   : > { %v1549_v6 = vld [vmem:[%s2729_s9] ss:$0 sm:$0xff]  ;;  %s2002_s16 = sshll.u32 %s2100_s18, 4  ;;  %s2003_s16 = int_to_ptr.vmem [resolvable:$false] %s2002_s16 }
 0x5ae   : > { %p2000_p7 = pnand %p1999_p13, %p2728_p0  ;;  %s2004_s5 = scalar_lea.vmem %s2003_s16, 256 }
 0x5af   : > { %p2005_p5 = scmp.lt.s32.totalorder %s2603_s17, %s2003_s16  ;;  %p2006_p2 = scmp.lt.s32.totalorder %s2004_s5, %s1998_s15 }
 0x5b0   : > { %s2601_s29 = scalar_lea.hbm %s2730_s14, %s1555_s10  ;;  %p2001_p3 = pneg %p2000_p7 }
 0x5b1   : > { %p2007_p8 = por %p2006_p2, %p2005_p5 }
 0x5b3   : > { %p2008_p11 = pnand %p2007_p8, %p2001_p3 }
 0x66d   : > { %v1289_v7 = vpop.f32.mrb[20].mxu1 }
 0x66e   : > { %v1290_v8 = vadd.f32 %v1549_v6, %v1289_v7  ;;  %v1667_v9 = vpop.f32.mrb[21].mxu1 }
 0x66f   : > { %v1292_v10 = vpop.f32.mrb[22].mxu1 }
 0x670   : > { %v1668_v11 = vpop.f32.mrb[23].mxu1  ;;  %1295 = vst.msk [vmem:[%s547_s19] sm:$0xff] %vm581_vm1, %v1290_v8 }
 0x671   : > { %2011 = shalt.err (!%p2008_p11)
}
 0x672   : > { %s2012_s26 = scalar_lea.hbm %s2601_s29, 128  ;;  %s2016_s12 = scalar_lea.hbm %s2730_s14, 256 }
 0x673   : > { %p2013_p12 = scmp.ne.s32.totalorder %s2601_s29, %s2012_s26  ;;  %p2017_p10 = scmp.lt.u32.totalorder %s2601_s29, %s2730_s14 }
 0x674   : > { %p2018_p4 = scmp.lt.u32.totalorder %s2016_s12, %s2012_s26  ;;  %p2020_p13 = scmp.lt.u32.totalorder %s2012_s26, %s2601_s29 }
 0x675   : > { %p2014_p1 = pnand %p2013_p12, %p2728_p0 }
 0x676   : > { %p2019_p9 = por %p2018_p4, %p2017_p10 }
 0x677   : > { %p2015_p6 = pneg %p2014_p1 }
 0x678   : > { %p2021_p7 = por %p2020_p13, %p2019_p9 }
 0x67a   : > { %p2022_p3 = pnand %p2021_p7, %p2015_p6 }
 0x67c   : > { %2025 = shalt.err (!%p2022_p3)
}
 0x67d   : > { %1687 = dma.vmem_to_hbm [thread:$0]  (%p2728_p0), %s2603_s17, 128, %s2601_s29, %s1297_s25  }
 0x67e PF: > { %s2731_s30 = sld [smem:[#allocation22_spill]]  ;;  %s2732_s9 = sld [smem:[#allocation24_spill]] }
 0x67f   : > { %s2733_s10 = sld [smem:[#allocation23_spill]] }
 0x684   : > { %s1343_s19 = sand.u32 1, %s2731_s30   ;;  %p2734_p5 = scmp.ne.s32.totalorder %s2732_s9, 0 }
 0x685   : > { %p2735_p2 = scmp.ge.s32.totalorder %s2733_s10, 2  ;;  %s1344_s1 = scalar_lea.sflag [#allocation4], %s1343_s19 }
 0x687   : > { %p1712_p8 = pnand %p2735_p2, %p2734_p5 }
 0x689   : > { %2059 = dma.done.wait (!%p1712_p8), %s1344_s1, 128  }
 0x68a   : > { %2061 = vsyncadd (!%p1712_p8), %s1344_s1, 4294967168  ;;  %s1353_s3 = scalar_lea.sflag [#allocation15], %s1343_s19 }
 0x68b   : > { %2063 = dma.done.wait (!%p1712_p8), %s1353_s3, 512  }
 0x68c   : > { %2065 = vsyncadd (!%p1712_p8), %s1353_s3, 4294966784  ;;  %s2736_s24 = sld [smem:[#allocation25_spill]]  ;;  %s2737_s27 = sld [smem:[#allocation26_spill]] }
 0x68d   : > { %s2738_s21 = smov %s2072_s22  ;;  %s2739_s22 = smov %s2076_s23 }
 0x692   : > { %p34_p0 = scmp.ge.s32.totalorder %s2736_s24, 4   ;;  %s2740_s23 = smov %s2737_s27 }
 0x694   :  { %36 = sbr.rel (!%p34_p0) target bundleno = 19 (0x13), region = 165 }
 0x69b   :  { %1358 = vsyncpa [#allocation3], 1 }
 0x69c   :  { %1360 = vsyncpa [#allocation3 + $0x1], 1 }
 0x69d   :  { %1361 = vsyncpa [#allocation6], 1 }
 0x69e   :  { %1363 = vsyncpa [#allocation6 + $0x1], 1 }
 0x69f   :  { %1364 = vsyncpa [#allocation9], 1 }
 0x6a0   :  { %1365 = vsyncpa [#allocation12], 1 }
 0x6a1   :  { %1366 = vsyncpa [#allocation4], 1 }
 0x6a2   :  { %1368 = vsyncpa [#allocation4 + $0x1], 1 }
 0x6a3   :  { %1369 = vsyncpa [#allocation15], 1 }
 0x6a4   :  { %1371 = vsyncpa [#allocation15 + $0x1], 1 }

</bundles_post_ra>
